<compile_context>
chip_gen: v7x
topology: tpu7x:2x2x1
jax: 0.10.0
libtpu: 0.0.40
codegen_flags: <defaults>
</compile_context>

<pallas_src>
import jax
import jax.numpy as jnp
from jax import lax
from jax.experimental import pallas as pl
from jax.experimental.pallas import tpu as pltpu


def _make_attention_kernel(n_heads: int, head_dim: int, s_kv: int,
                           proj_chunk: int):
    n_chunks = -(-s_kv // proj_chunk)  # ceil div (static)

    def kernel(q_ref, k_ref, v_ref,
               wq_ref, bq_ref, wk_ref, bk_ref, wv_ref, bv_ref,
               wo_ref, bo_ref,
               o_ref,
               k_scr, v_scr, x_scr):
        qb = pl.program_id(1)

        # ---- K/V projection: once per batch element (qb == 0), chunked over
        # S_kv so the f32 transient is bounded to (proj_chunk, H). Results go
        # to flat lane-dense bf16 scratch reused by every query block. -------
        @pl.when(qb == 0)
        def _():
            for c in range(n_chunks):                        # static unroll
                lo = c * proj_chunk
                rows = min(proj_chunk, s_kv - lo)            # static
                kc = k_ref[0, lo:lo + rows, :]               # (rows, H) bf16
                vc = v_ref[0, lo:lo + rows, :]
                kp = jnp.dot(kc, wk_ref[...],
                             preferred_element_type=jnp.float32) + bk_ref[...]
                vp = jnp.dot(vc, wv_ref[...],
                             preferred_element_type=jnp.float32) + bv_ref[...]
                k_scr[lo:lo + rows, :] = kp.astype(jnp.bfloat16)
                v_scr[lo:lo + rows, :] = vp.astype(jnp.bfloat16)

        # ---- Q projection for this query block (1/sqrt(D) pre-folded). -----
        q = q_ref[0]                                         # (bq, H) bf16
        qp = jnp.dot(q, wq_ref[...],
                     preferred_element_type=jnp.float32) + bq_ref[...]
        q16 = qp.astype(jnp.bfloat16)

        # Ones column for the MXU-folded softmax row-sum (hoisted: one copy).
        ones_kv = jnp.ones((s_kv, 1), jnp.bfloat16)

        # ---- Per-head attention: f32 softmax math, bf16 MXU operands; each
        # normalized head written straight into the (bq, H) output slab. -----
        # NOTE: for production shapes head_dim should be a multiple of 128 so
        # the per-head lane slices are aligned and the MXU contraction is fed.
        for h in range(n_heads):                             # static unroll
            lo = h * head_dim
            hi = lo + head_dim
            qh = q16[:, lo:hi]                               # (bq, D)   bf16
            kh = k_scr[:, lo:hi]                             # (S_kv, D) bf16
            vh = v_scr[:, lo:hi]                             # (S_kv, D) bf16

            # energy = Qh @ Kh^T -- contract last dims, no transpose copy.
            s = lax.dot_general(qh, kh, (((1,), (1,)), ((), ())),
                                preferred_element_type=jnp.float32)  # (bq,S_kv)
            m = jnp.max(s, axis=-1, keepdims=True)           # XLU row-max
            p = jnp.exp(s - m)                               # EUP (f32)
            p16 = p.astype(jnp.bfloat16)
            ctx = jnp.dot(p16, vh,
                          preferred_element_type=jnp.float32)        # (bq, D)
            # Row-sum on the MXU (ones column) instead of an XLU reduction.
            l = jnp.dot(p16, ones_kv,
                        preferred_element_type=jnp.float32)          # (bq, 1)
            # Approximate reciprocal (EUP vrcp): not bit-exact vs reference.
            x_scr[:, lo:hi] = (ctx * pl.reciprocal(l, approx=True)
                               ).astype(jnp.bfloat16)

        # ---- Output projection on the lane-dense (bq, H) slab. -------------
        out = jnp.dot(x_scr[...], wo_ref[...],
                      preferred_element_type=jnp.float32) + bo_ref[...]
        o_ref[0] = out.astype(o_ref.dtype)

    return kernel


def _vmem_bytes_estimate(hid_dim: int, s_kv: int, block_q: int,
                         proj_chunk: int) -> int:
    """Residency math for vmem_limit_bytes (bf16 = 2 B, f32 = 4 B)."""
    bf2, f4 = 2, 4
    est = 0
    est += 2 * block_q * hid_dim * bf2        # q input (double-buffered)
    est += 2 * 2 * s_kv * hid_dim * bf2       # k, v inputs (double-buffered)
    est += 4 * hid_dim * hid_dim * bf2        # weights (single VMEM copy)
    est += 4 * max(hid_dim, 128) * f4         # biases (row padded)
    est += 2 * block_q * hid_dim * f4         # f32 output (double-buffered)
    est += 2 * s_kv * hid_dim * bf2           # projected K/V scratch
    est += block_q * hid_dim * bf2            # output slab scratch
    est += 2 * proj_chunk * hid_dim * f4      # f32 K/V projection transient
    est += block_q * hid_dim * f4             # f32 Q projection transient
    est += 4 * block_q * s_kv * f4            # scores / exp transients
    return est


def self_attention_pallas(query, key, value, params, n_heads: int,
                          block_q: int | None = None):
    """query/key/value: (B, S, H). params: dict of nn.Linear weights/biases."""
    B, Sq, H = query.shape
    Bk, S_kv, Hk = key.shape
    assert Bk == B and Hk == H and value.shape == key.shape
    assert H % n_heads == 0
    D = H // n_heads

    if block_q is None:
        # v6e with moderate S_kv can take 512; keep 256 on v5e/v7x.
        block_q = min(Sq, 256)
    assert Sq % block_q == 0
    n_q_blocks = Sq // block_q

    proj_chunk = min(S_kv, 512)               # bounds the f32 K/V transient

    inv_scale = 1.0 / (float(D) ** 0.5)

    # Pre-transpose nn.Linear weights (out,in) -> (in,out); fold 1/sqrt(D)
    # into the Q projection; bf16 weights for the MXU, f32 biases.
    wq = (params["wq"].T * inv_scale).astype(jnp.bfloat16)
    bq = (params["bq"] * inv_scale).reshape(1, H).astype(jnp.float32)
    wk = params["wk"].T.astype(jnp.bfloat16)
    bk = params["bk"].reshape(1, H).astype(jnp.float32)
    wv = params["wv"].T.astype(jnp.bfloat16)
    bv = params["bv"].reshape(1, H).astype(jnp.float32)
    wo = params["wo"].T.astype(jnp.bfloat16)
    bo = params["bo"].reshape(1, H).astype(jnp.float32)

    q_bf = query.astype(jnp.bfloat16)
    k_bf = key.astype(jnp.bfloat16)
    v_bf = value.astype(jnp.bfloat16)

    kernel = _make_attention_kernel(n_heads, D, S_kv, proj_chunk)

    q_spec = pl.BlockSpec((1, block_q, H), lambda b, qb: (b, qb, 0))
    # K/V: full-length per-batch blocks, consumed only at qb == 0.
    # On v7x add pipeline_mode=pl.Buffered(1) here to halve their VMEM cost.
    kv_spec = pl.BlockSpec((1, S_kv, H), lambda b, qb: (b, 0, 0))
    # Weights/biases: full VMEM-resident operands (single copy, no
    # double-buffer reservation, no per-step DMA).
    w_spec = pl.BlockSpec(memory_space=pltpu.MemorySpace.VMEM)
    b_spec = pl.BlockSpec(memory_space=pltpu.MemorySpace.VMEM)
    o_spec = pl.BlockSpec((1, block_q, H), lambda b, qb: (b, qb, 0))

    vmem_limit = int(min(128 * 1024 * 1024,
                         max(32 * 1024 * 1024,
                             1.3 * _vmem_bytes_estimate(H, S_kv, block_q,
                                                        proj_chunk))))

    return pl.pallas_call(
        kernel,
        out_shape=jax.ShapeDtypeStruct((B, Sq, H), query.dtype),
        grid_spec=pltpu.PrefetchScalarGridSpec(
            num_scalar_prefetch=0,
            grid=(B, n_q_blocks),
            in_specs=[q_spec, kv_spec, kv_spec,
                      w_spec, b_spec, w_spec, b_spec, w_spec, b_spec,
                      w_spec, b_spec],
            out_specs=o_spec,
            scratch_shapes=[pltpu.VMEM((S_kv, H), jnp.bfloat16),   # K proj
                            pltpu.VMEM((S_kv, H), jnp.bfloat16),   # V proj
                            pltpu.VMEM((block_q, H), jnp.bfloat16)]),  # slab
        compiler_params=pltpu.CompilerParams(
            # qb is "arbitrary": projected K/V in scratch carry across q-blocks.
            dimension_semantics=("parallel", "arbitrary"),
            vmem_limit_bytes=vmem_limit),
    )(q_bf, k_bf, v_bf, wq, bq, wk, bk, wv, bv, wo, bo)


def self_attention_reference(query, key, value, params, n_heads: int):
    """Plain-JAX f32 reference mirroring the PyTorch forward."""
    B, S, H = query.shape
    D = H // n_heads
    scale = jnp.sqrt(jnp.float32(D))

    def lin(x, w, b):
        return x @ w.T + b

    Q = lin(query, params["wq"], params["bq"])
    K = lin(key, params["wk"], params["bk"])
    V = lin(value, params["wv"], params["bv"])

    def split(x):
        return x.reshape(B, -1, n_heads, D).transpose(0, 2, 1, 3)

    Qh, Kh, Vh = split(Q), split(K), split(V)
    energy = jnp.einsum("bhqd,bhkd->bhqk", Qh, Kh) / scale
    attn = jax.nn.softmax(energy, axis=-1)
    x = jnp.einsum("bhqk,bhkd->bhqd", attn, Vh)
    x = x.transpose(0, 2, 1, 3).reshape(B, -1, H)
    return lin(x, params["wo"], params["bo"])


def init_params(key, hid_dim: int):
    """Deterministic nn.Linear-style init: U(-1/sqrt(in), 1/sqrt(in))."""
    keys = jax.random.split(key, 8)
    bound = 1.0 / (hid_dim ** 0.5)

    def u(k, shape):
        return jax.random.uniform(k, shape, jnp.float32, -bound, bound)

    return {
        "wq": u(keys[0], (hid_dim, hid_dim)), "bq": u(keys[1], (hid_dim,)),
        "wk": u(keys[2], (hid_dim, hid_dim)), "bk": u(keys[3], (hid_dim,)),
        "wv": u(keys[4], (hid_dim, hid_dim)), "bv": u(keys[5], (hid_dim,)),
        "wo": u(keys[6], (hid_dim, hid_dim)), "bo": u(keys[7], (hid_dim,)),
    }


if __name__ == "__main__":
    B, S, H, N_HEADS = 2, 8, 32, 4

    root = jax.random.PRNGKey(0)
    k_p, k_q, k_k, k_v = jax.random.split(root, 4)

    params = init_params(k_p, H)
    query = jax.random.normal(k_q, (B, S, H), jnp.float32)
    key = jax.random.normal(k_k, (B, S, H), jnp.float32)
    value = jax.random.normal(k_v, (B, S, H), jnp.float32)

    out = self_attention_pallas(query, key, value, params, N_HEADS)
    out = jax.block_until_ready(out)

    ref = self_attention_reference(query, key, value, params, N_HEADS)
    assert out.shape == (B, S, H)
    # Kernel uses bf16 MXU operands (f32 accumulation/softmax) and an
    # approximate reciprocal, so compare with a bf16-appropriate tolerance.
    assert jnp.allclose(out, ref, atol=5e-2, rtol=5e-2), "mismatch vs reference"

    print("KERNEL_OK")
</pallas_src>

<mosaic_0001>
module attributes {stable_mosaic.version = 11 : i64} {
  func.func @kernel(%arg0: i32, %arg1: i32, %arg2: memref<1x8x32xbf16, #tpu.memory_space<vmem>>, %arg3: memref<1x8x32xbf16, #tpu.memory_space<vmem>>, %arg4: memref<1x8x32xbf16, #tpu.memory_space<vmem>>, %arg5: memref<32x32xbf16, #tpu.memory_space<vmem>>, %arg6: memref<1x32xf32, #tpu.memory_space<vmem>>, %arg7: memref<32x32xbf16, #tpu.memory_space<vmem>>, %arg8: memref<1x32xf32, #tpu.memory_space<vmem>>, %arg9: memref<32x32xbf16, #tpu.memory_space<vmem>>, %arg10: memref<1x32xf32, #tpu.memory_space<vmem>>, %arg11: memref<32x32xbf16, #tpu.memory_space<vmem>>, %arg12: memref<1x32xf32, #tpu.memory_space<vmem>>, %arg13: memref<1x8x32xf32, #tpu.memory_space<vmem>>, %arg14: memref<8x32xbf16, #tpu.memory_space<vmem>>, %arg15: memref<8x32xbf16, #tpu.memory_space<vmem>>, %arg16: memref<8x32xbf16, #tpu.memory_space<vmem>>) attributes {dimension_semantics = [#tpu.dimension_semantics<parallel>, #tpu.dimension_semantics<arbitrary>], iteration_bounds = array<i64: 2, 1>, scalar_prefetch = 0 : i64, scratch_operands = 3 : i64, tpu.core_type = #tpu.core_type<tc>, window_params = [{transform_indices = @transform_0, window_bounds = array<i64: 1, 8, 32>}, {transform_indices = @transform_1, window_bounds = array<i64: 1, 8, 32>}, {transform_indices = @transform_2, window_bounds = array<i64: 1, 8, 32>}, {pipeline_mode = #tpu.pipeline_mode<synchronous>, transform_indices = @transform_3, window_bounds = array<i64: 32, 32>}, {pipeline_mode = #tpu.pipeline_mode<synchronous>, transform_indices = @transform_4, window_bounds = array<i64: 1, 32>}, {pipeline_mode = #tpu.pipeline_mode<synchronous>, transform_indices = @transform_5, window_bounds = array<i64: 32, 32>}, {pipeline_mode = #tpu.pipeline_mode<synchronous>, transform_indices = @transform_6, window_bounds = array<i64: 1, 32>}, {pipeline_mode = #tpu.pipeline_mode<synchronous>, transform_indices = @transform_7, window_bounds = array<i64: 32, 32>}, {pipeline_mode = #tpu.pipeline_mode<synchronous>, transform_indices = @transform_8, window_bounds = array<i64: 1, 32>}, {pipeline_mode = #tpu.pipeline_mode<synchronous>, transform_indices = @transform_9, window_bounds = array<i64: 32, 32>}, {pipeline_mode = #tpu.pipeline_mode<synchronous>, transform_indices = @transform_10, window_bounds = array<i64: 1, 32>}, {transform_indices = @transform_11, window_bounds = array<i64: 1, 8, 32>}]} {
    %c0_i32 = arith.constant 0 : i32
    %0 = arith.cmpi eq, %arg1, %c0_i32 : i32
    %1 = arith.extui %0 : i1 to i32
    %c0_i32_0 = arith.constant 0 : i32
    %2 = arith.cmpi ne, %1, %c0_i32_0 : i32
    scf.if %2 {
      %c0_55 = arith.constant 0 : index
      %c0_56 = arith.constant 0 : index
      %c0_57 = arith.constant 0 : index
      %89 = vector.load %arg3[%c0_55, %c0_56, %c0_57] : memref<1x8x32xbf16, #tpu.memory_space<vmem>>, vector<1x8x32xbf16>
      %90 = vector.shape_cast %89 : vector<1x8x32xbf16> to vector<8x32xbf16>
      %c0_58 = arith.constant 0 : index
      %c0_59 = arith.constant 0 : index
      %c0_60 = arith.constant 0 : index
      %91 = vector.load %arg4[%c0_58, %c0_59, %c0_60] : memref<1x8x32xbf16, #tpu.memory_space<vmem>>, vector<1x8x32xbf16>
      %92 = vector.shape_cast %91 : vector<1x8x32xbf16> to vector<8x32xbf16>
      %c0_61 = arith.constant 0 : index
      %c0_62 = arith.constant 0 : index
      %93 = vector.load %arg7[%c0_61, %c0_62] : memref<32x32xbf16, #tpu.memory_space<vmem>>, vector<32x32xbf16>
      %cst_63 = arith.constant dense<0.000000e+00> : vector<8x32xf32>
      %94 = tpu.matmul %90, %93, %cst_63 {dimension_numbers = #tpu.dot_dimension_numbers<[1], [0], [0], [1], [0, 0, 1, 1], [], []>} : vector<8x32xbf16>, vector<32x32xbf16>, vector<8x32xf32> -> vector<8x32xf32>
      %c0_64 = arith.constant 0 : index
      %c0_65 = arith.constant 0 : index
      %95 = vector.load %arg8[%c0_64, %c0_65] : memref<1x32xf32, #tpu.memory_space<vmem>>, vector<1x32xf32>
      %96 = vector.broadcast %95 : vector<1x32xf32> to vector<8x32xf32>
      %97 = arith.addf %94, %96 : vector<8x32xf32>
      %c0_66 = arith.constant 0 : index
      %c0_67 = arith.constant 0 : index
      %98 = vector.load %arg9[%c0_66, %c0_67] : memref<32x32xbf16, #tpu.memory_space<vmem>>, vector<32x32xbf16>
      %cst_68 = arith.constant dense<0.000000e+00> : vector<8x32xf32>
      %99 = tpu.matmul %92, %98, %cst_68 {dimension_numbers = #tpu.dot_dimension_numbers<[1], [0], [0], [1], [0, 0, 1, 1], [], []>} : vector<8x32xbf16>, vector<32x32xbf16>, vector<8x32xf32> -> vector<8x32xf32>
      %c0_69 = arith.constant 0 : index
      %c0_70 = arith.constant 0 : index
      %100 = vector.load %arg10[%c0_69, %c0_70] : memref<1x32xf32, #tpu.memory_space<vmem>>, vector<1x32xf32>
      %101 = vector.broadcast %100 : vector<1x32xf32> to vector<8x32xf32>
      %102 = arith.addf %99, %101 : vector<8x32xf32>
      %103 = arith.truncf %97 : vector<8x32xf32> to vector<8x32xbf16>
      %c0_71 = arith.constant 0 : index
      %c0_72 = arith.constant 0 : index
      %104 = vector.load %arg14[%c0_71, %c0_72] : memref<8x32xbf16, #tpu.memory_space<vmem>>, vector<8x32xbf16>
      tpu.vector_store %arg14[%c0_71, %c0_72], %103 {strides = array<i32>} : memref<8x32xbf16, #tpu.memory_space<vmem>>, vector<8x32xbf16>,
      %105 = arith.truncf %102 : vector<8x32xf32> to vector<8x32xbf16>
      %c0_73 = arith.constant 0 : index
      %c0_74 = arith.constant 0 : index
      %106 = vector.load %arg15[%c0_73, %c0_74] : memref<8x32xbf16, #tpu.memory_space<vmem>>, vector<8x32xbf16>
      tpu.vector_store %arg15[%c0_73, %c0_74], %105 {strides = array<i32>} : memref<8x32xbf16, #tpu.memory_space<vmem>>, vector<8x32xbf16>,
    } else {
    }
    %c0 = arith.constant 0 : index
    %c0_1 = arith.constant 0 : index
    %c0_2 = arith.constant 0 : index
    %3 = vector.load %arg2[%c0, %c0_1, %c0_2] : memref<1x8x32xbf16, #tpu.memory_space<vmem>>, vector<1x8x32xbf16>
    %4 = vector.shape_cast %3 : vector<1x8x32xbf16> to vector<8x32xbf16>
    %c0_3 = arith.constant 0 : index
    %c0_4 = arith.constant 0 : index
    %5 = vector.load %arg5[%c0_3, %c0_4] : memref<32x32xbf16, #tpu.memory_space<vmem>>, vector<32x32xbf16>
    %cst = arith.constant dense<0.000000e+00> : vector<8x32xf32>
    %6 = tpu.matmul %4, %5, %cst {dimension_numbers = #tpu.dot_dimension_numbers<[1], [0], [0], [1], [0, 0, 1, 1], [], []>} : vector<8x32xbf16>, vector<32x32xbf16>, vector<8x32xf32> -> vector<8x32xf32>
    %c0_5 = arith.constant 0 : index
    %c0_6 = arith.constant 0 : index
    %7 = vector.load %arg6[%c0_5, %c0_6] : memref<1x32xf32, #tpu.memory_space<vmem>>, vector<1x32xf32>
    %8 = vector.broadcast %7 : vector<1x32xf32> to vector<8x32xf32>
    %9 = arith.addf %6, %8 : vector<8x32xf32>
    %10 = arith.truncf %9 : vector<8x32xf32> to vector<8x32xbf16>
    %cst_7 = arith.constant 1.000000e+00 : bf16
    %11 = vector.broadcast %cst_7 : bf16 to vector<8x1xbf16>
    %12 = vector.extract_strided_slice %10 {offsets = [0, 0], sizes = [8, 8], strides = [1, 1]} : vector<8x32xbf16> to vector<8x8xbf16>
    %c0_8 = arith.constant 0 : index
    %c0_9 = arith.constant 0 : index
    %13 = vector.load %arg14[%c0_8, %c0_9] : memref<8x32xbf16, #tpu.memory_space<vmem>>, vector<8x8xbf16>
    %c0_10 = arith.constant 0 : index
    %c0_11 = arith.constant 0 : index
    %14 = vector.load %arg15[%c0_10, %c0_11] : memref<8x32xbf16, #tpu.memory_space<vmem>>, vector<8x8xbf16>
    %cst_12 = arith.constant dense<0.000000e+00> : vector<8x8xf32>
    %15 = tpu.matmul %12, %13, %cst_12 {dimension_numbers = #tpu.dot_dimension_numbers<[1], [1], [0], [0], [0, 0, 1, 0], [], []>} : vector<8x8xbf16>, vector<8x8xbf16>, vector<8x8xf32> -> vector<8x8xf32>
    %cst_13 = arith.constant dense<0xFF800000> : vector<8xf32>
    %16 = vector.multi_reduction <maximumf>, %15, %cst_13 [1] : vector<8x8xf32> to vector<8xf32>
    %17 = vector.shape_cast %16 : vector<8xf32> to vector<8x1xf32>
    %18 = vector.broadcast %17 : vector<8x1xf32> to vector<8x8xf32>
    %19 = arith.subf %15, %18 : vector<8x8xf32>
    %20 = math.exp %19 : vector<8x8xf32>
    %21 = arith.truncf %20 : vector<8x8xf32> to vector<8x8xbf16>
    %cst_14 = arith.constant dense<0.000000e+00> : vector<8x8xf32>
    %22 = tpu.matmul %21, %14, %cst_14 {dimension_numbers = #tpu.dot_dimension_numbers<[1], [0], [0], [1], [0, 0, 1, 1], [], []>} : vector<8x8xbf16>, vector<8x8xbf16>, vector<8x8xf32> -> vector<8x8xf32>
    %cst_15 = arith.constant dense<0.000000e+00> : vector<8x1xf32>
    %23 = tpu.matmul %21, %11, %cst_15 {dimension_numbers = #tpu.dot_dimension_numbers<[1], [0], [0], [1], [0, 0, 1, 1], [], []>} : vector<8x8xbf16>, vector<8x1xbf16>, vector<8x1xf32> -> vector<8x1xf32>
    %24 = tpu.reciprocal %23 {approx = true} : vector<8x1xf32> -> vector<8x1xf32>
    %25 = vector.broadcast %24 : vector<8x1xf32> to vector<8x8xf32>
    %26 = arith.mulf %22, %25 : vector<8x8xf32>
    %27 = arith.truncf %26 : vector<8x8xf32> to vector<8x8xbf16>
    %c0_16 = arith.constant 0 : index
    %c0_17 = arith.constant 0 : index
    %28 = vector.load %arg16[%c0_16, %c0_17] : memref<8x32xbf16, #tpu.memory_space<vmem>>, vector<8x8xbf16>
    tpu.vector_store %arg16[%c0_16, %c0_17], %27 {strides = array<i32>} : memref<8x32xbf16, #tpu.memory_space<vmem>>, vector<8x8xbf16>,
    %29 = vector.extract_strided_slice %10 {offsets = [0, 8], sizes = [8, 8], strides = [1, 1]} : vector<8x32xbf16> to vector<8x8xbf16>
    %c0_18 = arith.constant 0 : index
    %c8 = arith.constant 8 : index
    %30 = vector.load %arg14[%c0_18, %c8] : memref<8x32xbf16, #tpu.memory_space<vmem>>, vector<8x8xbf16>
    %c0_19 = arith.constant 0 : index
    %c8_20 = arith.constant 8 : index
    %31 = vector.load %arg15[%c0_19, %c8_20] : memref<8x32xbf16, #tpu.memory_space<vmem>>, vector<8x8xbf16>
    %cst_21 = arith.constant dense<0.000000e+00> : vector<8x8xf32>
    %32 = tpu.matmul %29, %30, %cst_21 {dimension_numbers = #tpu.dot_dimension_numbers<[1], [1], [0], [0], [0, 0, 1, 0], [], []>} : vector<8x8xbf16>, vector<8x8xbf16>, vector<8x8xf32> -> vector<8x8xf32>
    %cst_22 = arith.constant dense<0xFF800000> : vector<8xf32>
    %33 = vector.multi_reduction <maximumf>, %32, %cst_22 [1] : vector<8x8xf32> to vector<8xf32>
    %34 = vector.shape_cast %33 : vector<8xf32> to vector<8x1xf32>
    %35 = vector.broadcast %34 : vector<8x1xf32> to vector<8x8xf32>
    %36 = arith.subf %32, %35 : vector<8x8xf32>
    %37 = math.exp %36 : vector<8x8xf32>
    %38 = arith.truncf %37 : vector<8x8xf32> to vector<8x8xbf16>
    %cst_23 = arith.constant dense<0.000000e+00> : vector<8x8xf32>
    %39 = tpu.matmul %38, %31, %cst_23 {dimension_numbers = #tpu.dot_dimension_numbers<[1], [0], [0], [1], [0, 0, 1, 1], [], []>} : vector<8x8xbf16>, vector<8x8xbf16>, vector<8x8xf32> -> vector<8x8xf32>
    %cst_24 = arith.constant dense<0.000000e+00> : vector<8x1xf32>
    %40 = tpu.matmul %38, %11, %cst_24 {dimension_numbers = #tpu.dot_dimension_numbers<[1], [0], [0], [1], [0, 0, 1, 1], [], []>} : vector<8x8xbf16>, vector<8x1xbf16>, vector<8x1xf32> -> vector<8x1xf32>
    %41 = tpu.reciprocal %40 {approx = true} : vector<8x1xf32> -> vector<8x1xf32>
    %42 = vector.broadcast %41 : vector<8x1xf32> to vector<8x8xf32>
    %43 = arith.mulf %39, %42 : vector<8x8xf32>
    %44 = arith.truncf %43 : vector<8x8xf32> to vector<8x8xbf16>
    %c0_25 = arith.constant 0 : index
    %c8_26 = arith.constant 8 : index
    %45 = vector.load %arg16[%c0_25, %c8_26] : memref<8x32xbf16, #tpu.memory_space<vmem>>, vector<8x8xbf16>
    tpu.vector_store %arg16[%c0_25, %c8_26], %44 {strides = array<i32>} : memref<8x32xbf16, #tpu.memory_space<vmem>>, vector<8x8xbf16>,
    %46 = vector.extract_strided_slice %10 {offsets = [0, 16], sizes = [8, 8], strides = [1, 1]} : vector<8x32xbf16> to vector<8x8xbf16>
    %c0_27 = arith.constant 0 : index
    %c16 = arith.constant 16 : index
    %47 = vector.load %arg14[%c0_27, %c16] : memref<8x32xbf16, #tpu.memory_space<vmem>>, vector<8x8xbf16>
    %c0_28 = arith.constant 0 : index
    %c16_29 = arith.constant 16 : index
    %48 = vector.load %arg15[%c0_28, %c16_29] : memref<8x32xbf16, #tpu.memory_space<vmem>>, vector<8x8xbf16>
    %cst_30 = arith.constant dense<0.000000e+00> : vector<8x8xf32>
    %49 = tpu.matmul %46, %47, %cst_30 {dimension_numbers = #tpu.dot_dimension_numbers<[1], [1], [0], [0], [0, 0, 1, 0], [], []>} : vector<8x8xbf16>, vector<8x8xbf16>, vector<8x8xf32> -> vector<8x8xf32>
    %cst_31 = arith.constant dense<0xFF800000> : vector<8xf32>
    %50 = vector.multi_reduction <maximumf>, %49, %cst_31 [1] : vector<8x8xf32> to vector<8xf32>
    %51 = vector.shape_cast %50 : vector<8xf32> to vector<8x1xf32>
    %52 = vector.broadcast %51 : vector<8x1xf32> to vector<8x8xf32>
    %53 = arith.subf %49, %52 : vector<8x8xf32>
    %54 = math.exp %53 : vector<8x8xf32>
    %55 = arith.truncf %54 : vector<8x8xf32> to vector<8x8xbf16>
    %cst_32 = arith.constant dense<0.000000e+00> : vector<8x8xf32>
    %56 = tpu.matmul %55, %48, %cst_32 {dimension_numbers = #tpu.dot_dimension_numbers<[1], [0], [0], [1], [0, 0, 1, 1], [], []>} : vector<8x8xbf16>, vector<8x8xbf16>, vector<8x8xf32> -> vector<8x8xf32>
    %cst_33 = arith.constant dense<0.000000e+00> : vector<8x1xf32>
    %57 = tpu.matmul %55, %11, %cst_33 {dimension_numbers = #tpu.dot_dimension_numbers<[1], [0], [0], [1], [0, 0, 1, 1], [], []>} : vector<8x8xbf16>, vector<8x1xbf16>, vector<8x1xf32> -> vector<8x1xf32>
    %58 = tpu.reciprocal %57 {approx = true} : vector<8x1xf32> -> vector<8x1xf32>
    %59 = vector.broadcast %58 : vector<8x1xf32> to vector<8x8xf32>
    %60 = arith.mulf %56, %59 : vector<8x8xf32>
    %61 = arith.truncf %60 : vector<8x8xf32> to vector<8x8xbf16>
    %c0_34 = arith.constant 0 : index
    %c16_35 = arith.constant 16 : index
    %62 = vector.load %arg16[%c0_34, %c16_35] : memref<8x32xbf16, #tpu.memory_space<vmem>>, vector<8x8xbf16>
    tpu.vector_store %arg16[%c0_34, %c16_35], %61 {strides = array<i32>} : memref<8x32xbf16, #tpu.memory_space<vmem>>, vector<8x8xbf16>,
    %63 = vector.extract_strided_slice %10 {offsets = [0, 24], sizes = [8, 8], strides = [1, 1]} : vector<8x32xbf16> to vector<8x8xbf16>
    %c0_36 = arith.constant 0 : index
    %c24 = arith.constant 24 : index
    %64 = vector.load %arg14[%c0_36, %c24] : memref<8x32xbf16, #tpu.memory_space<vmem>>, vector<8x8xbf16>
    %c0_37 = arith.constant 0 : index
    %c24_38 = arith.constant 24 : index
    %65 = vector.load %arg15[%c0_37, %c24_38] : memref<8x32xbf16, #tpu.memory_space<vmem>>, vector<8x8xbf16>
    %cst_39 = arith.constant dense<0.000000e+00> : vector<8x8xf32>
    %66 = tpu.matmul %63, %64, %cst_39 {dimension_numbers = #tpu.dot_dimension_numbers<[1], [1], [0], [0], [0, 0, 1, 0], [], []>} : vector<8x8xbf16>, vector<8x8xbf16>, vector<8x8xf32> -> vector<8x8xf32>
    %cst_40 = arith.constant dense<0xFF800000> : vector<8xf32>
    %67 = vector.multi_reduction <maximumf>, %66, %cst_40 [1] : vector<8x8xf32> to vector<8xf32>
    %68 = vector.shape_cast %67 : vector<8xf32> to vector<8x1xf32>
    %69 = vector.broadcast %68 : vector<8x1xf32> to vector<8x8xf32>
    %70 = arith.subf %66, %69 : vector<8x8xf32>
    %71 = math.exp %70 : vector<8x8xf32>
    %72 = arith.truncf %71 : vector<8x8xf32> to vector<8x8xbf16>
    %cst_41 = arith.constant dense<0.000000e+00> : vector<8x8xf32>
    %73 = tpu.matmul %72, %65, %cst_41 {dimension_numbers = #tpu.dot_dimension_numbers<[1], [0], [0], [1], [0, 0, 1, 1], [], []>} : vector<8x8xbf16>, vector<8x8xbf16>, vector<8x8xf32> -> vector<8x8xf32>
    %cst_42 = arith.constant dense<0.000000e+00> : vector<8x1xf32>
    %74 = tpu.matmul %72, %11, %cst_42 {dimension_numbers = #tpu.dot_dimension_numbers<[1], [0], [0], [1], [0, 0, 1, 1], [], []>} : vector<8x8xbf16>, vector<8x1xbf16>, vector<8x1xf32> -> vector<8x1xf32>
    %75 = tpu.reciprocal %74 {approx = true} : vector<8x1xf32> -> vector<8x1xf32>
    %76 = vector.broadcast %75 : vector<8x1xf32> to vector<8x8xf32>
    %77 = arith.mulf %73, %76 : vector<8x8xf32>
    %78 = arith.truncf %77 : vector<8x8xf32> to vector<8x8xbf16>
    %c0_43 = arith.constant 0 : index
    %c24_44 = arith.constant 24 : index
    %79 = vector.load %arg16[%c0_43, %c24_44] : memref<8x32xbf16, #tpu.memory_space<vmem>>, vector<8x8xbf16>
    tpu.vector_store %arg16[%c0_43, %c24_44], %78 {strides = array<i32>} : memref<8x32xbf16, #tpu.memory_space<vmem>>, vector<8x8xbf16>,
    %c0_45 = arith.constant 0 : index
    %c0_46 = arith.constant 0 : index
    %80 = vector.load %arg16[%c0_45, %c0_46] : memref<8x32xbf16, #tpu.memory_space<vmem>>, vector<8x32xbf16>
    %c0_47 = arith.constant 0 : index
    %c0_48 = arith.constant 0 : index
    %81 = vector.load %arg11[%c0_47, %c0_48] : memref<32x32xbf16, #tpu.memory_space<vmem>>, vector<32x32xbf16>
    %cst_49 = arith.constant dense<0.000000e+00> : vector<8x32xf32>
    %82 = tpu.matmul %80, %81, %cst_49 {dimension_numbers = #tpu.dot_dimension_numbers<[1], [0], [0], [1], [0, 0, 1, 1], [], []>} : vector<8x32xbf16>, vector<32x32xbf16>, vector<8x32xf32> -> vector<8x32xf32>
    %c0_50 = arith.constant 0 : index
    %c0_51 = arith.constant 0 : index
    %83 = vector.load %arg12[%c0_50, %c0_51] : memref<1x32xf32, #tpu.memory_space<vmem>>, vector<1x32xf32>
    %84 = vector.broadcast %83 : vector<1x32xf32> to vector<8x32xf32>
    %85 = arith.addf %82, %84 : vector<8x32xf32>
    %c0_52 = arith.constant 0 : index
    %c0_53 = arith.constant 0 : index
    %c0_54 = arith.constant 0 : index
    %86 = vector.load %arg13[%c0_52, %c0_53, %c0_54] : memref<1x8x32xf32, #tpu.memory_space<vmem>>, vector<1x8x32xf32>
    %87 = vector.shape_cast %86 : vector<1x8x32xf32> to vector<8x32xf32>
    %88 = vector.shape_cast %85 : vector<8x32xf32> to vector<1x8x32xf32>
    tpu.vector_store %arg13[%c0_52, %c0_53, %c0_54], %88 {strides = array<i32>} : memref<1x8x32xf32, #tpu.memory_space<vmem>>, vector<1x8x32xf32>,
    return
  }
  func.func @transform_0(%arg0: i32, %arg1: i32) -> (i32, i32, i32) {
    %c0_i32 = arith.constant 0 : i32
    %c0_i32_0 = arith.constant 0 : i32
    return %arg0, %arg1, %c0_i32 : i32, i32, i32
  }
  func.func @transform_1(%arg0: i32, %arg1: i32) -> (i32, i32, i32) {
    %c0_i32 = arith.constant 0 : i32
    %c0_i32_0 = arith.constant 0 : i32
    %c0_i32_1 = arith.constant 0 : i32
    return %arg0, %c0_i32, %c0_i32_0 : i32, i32, i32
  }
  func.func @transform_2(%arg0: i32, %arg1: i32) -> (i32, i32, i32) {
    %c0_i32 = arith.constant 0 : i32
    %c0_i32_0 = arith.constant 0 : i32
    %c0_i32_1 = arith.constant 0 : i32
    return %arg0, %c0_i32, %c0_i32_0 : i32, i32, i32
  }
  func.func @transform_3(%arg0: i32, %arg1: i32) -> (i32, i32) {
    %c0_i32 = arith.constant 0 : i32
    %c0_i32_0 = arith.constant 0 : i32
    %c0_i32_1 = arith.constant 0 : i32
    return %c0_i32, %c0_i32_0 : i32, i32
  }
  func.func @transform_4(%arg0: i32, %arg1: i32) -> (i32, i32) {
    %c0_i32 = arith.constant 0 : i32
    %c0_i32_0 = arith.constant 0 : i32
    %c0_i32_1 = arith.constant 0 : i32
    return %c0_i32, %c0_i32_0 : i32, i32
  }
  func.func @transform_5(%arg0: i32, %arg1: i32) -> (i32, i32) {
    %c0_i32 = arith.constant 0 : i32
    %c0_i32_0 = arith.constant 0 : i32
    %c0_i32_1 = arith.constant 0 : i32
    return %c0_i32, %c0_i32_0 : i32, i32
  }
  func.func @transform_6(%arg0: i32, %arg1: i32) -> (i32, i32) {
    %c0_i32 = arith.constant 0 : i32
    %c0_i32_0 = arith.constant 0 : i32
    %c0_i32_1 = arith.constant 0 : i32
    return %c0_i32, %c0_i32_0 : i32, i32
  }
  func.func @transform_7(%arg0: i32, %arg1: i32) -> (i32, i32) {
    %c0_i32 = arith.constant 0 : i32
    %c0_i32_0 = arith.constant 0 : i32
    %c0_i32_1 = arith.constant 0 : i32
    return %c0_i32, %c0_i32_0 : i32, i32
  }
  func.func @transform_8(%arg0: i32, %arg1: i32) -> (i32, i32) {
    %c0_i32 = arith.constant 0 : i32
    %c0_i32_0 = arith.constant 0 : i32
    %c0_i32_1 = arith.constant 0 : i32
    return %c0_i32, %c0_i32_0 : i32, i32
  }
  func.func @transform_9(%arg0: i32, %arg1: i32) -> (i32, i32) {
    %c0_i32 = arith.constant 0 : i32
    %c0_i32_0 = arith.constant 0 : i32
    %c0_i32_1 = arith.constant 0 : i32
    return %c0_i32, %c0_i32_0 : i32, i32
  }
  func.func @transform_10(%arg0: i32, %arg1: i32) -> (i32, i32) {
    %c0_i32 = arith.constant 0 : i32
    %c0_i32_0 = arith.constant 0 : i32
    %c0_i32_1 = arith.constant 0 : i32
    return %c0_i32, %c0_i32_0 : i32, i32
  }
  func.func @transform_11(%arg0: i32, %arg1: i32) -> (i32, i32, i32) {
    %c0_i32 = arith.constant 0 : i32
    %c0_i32_0 = arith.constant 0 : i32
    return %arg0, %arg1, %c0_i32 : i32, i32, i32
  }
}

</mosaic_0001>

<bundles_post_ra>
// kernel: tpu_custom_call.1
= control target key start
LH: loop header
LB: loop body
LE: loop exit
PB: predicated region body
PF: predicated region fallthrough
CT: control target
= control target key end

     0   :  { %s2815_s0 = inlined_call_operand.hbm [shape: bf16[2,8,32], index: 0, kind: input, shape index: {}]   ;;  %s2816_s1 = inlined_call_operand.hbm [shape: bf16[2,8,32], index: 1, kind: input, shape index: {}]   ;;  %s2817_s2 = inlined_call_operand.hbm [shape: bf16[2,8,32], index: 2, kind: input, shape index: {}]   ;;  %s2818_s3 = inlined_call_operand.hbm [shape: bf16[32,32], index: 3, kind: input, shape index: {}]   ;;  %s2819_s4 = inlined_call_operand.vmem [shape: f32[1,32], index: 4, kind: input, shape index: {}]   ;;  %s2820_s5 = inlined_call_operand.vmem [shape: bf16[32,32], index: 5, kind: input, shape index: {}]   ;;  %s2821_s6 = inlined_call_operand.vmem [shape: f32[1,32], index: 6, kind: input, shape index: {}]   ;;  %s2822_s7 = inlined_call_operand.hbm [shape: bf16[32,32], index: 7, kind: input, shape index: {}]   ;;  %s2823_s8 = inlined_call_operand.hbm [shape: f32[1,32], index: 8, kind: input, shape index: {}]   ;;  %s2824_s9 = inlined_call_operand.vmem [shape: bf16[32,32], index: 9, kind: input, shape index: {}]   ;;  %s2825_s10 = inlined_call_operand.vmem [shape: f32[1,32], index: 10, kind: input, shape index: {}]   ;;  %s2826_s11 = inlined_call_operand.hbm [shape: f32[2,8,32], index: 11, kind: output, shape index: {}]  }
   0x1   :  { %2852 = sst [smem:[#allocation30_spill]] %s2816_s1 }
   0x2   :  { %2853 = sst [smem:[#allocation31_spill]] %s2818_s3 }
   0x3   :  { %2854 = sst [smem:[#allocation32_spill]] %s2819_s4 }
   0x4   :  { %2855 = sst [smem:[#allocation33_spill]] %s2821_s6 }
   0x5   :  { %2856 = sst [smem:[#allocation34_spill]] %s2824_s9 }
   0x6   :  { %2857 = sst [smem:[#allocation35_spill]] %s2825_s10 }
   0x7   :  { %2858 = sst [smem:[#allocation36_spill]] %s2826_s11 }
   0x8   :  { %16 = vsyncpa [#allocation6], 0 }
   0x9   :  { %18 = vsyncpa [#allocation6 + $0x1], 0 }
   0xa   :  { %19 = vsyncpa [#allocation9], 0 }
   0xb   :  { %21 = vsyncpa [#allocation9 + $0x1], 0 }
   0xc   :  { %22 = vsyncpa [#allocation12], 0 }
   0xd   :  { %23 = vsyncpa [#allocation15], 0 }
   0xe   :  { %24 = vsyncpa [#allocation7], 0 }
   0xf   :  { %26 = vsyncpa [#allocation7 + $0x1], 0  ;;  %s2345_s17 = smov 0   ;;  %s2347_s18 = smov 0  }
  0x10   :  { %s2349_s19 = smov 0   ;;  %s2351_s20 = smov 0  }
  0x11   :  { %s2353_s21 = smov 0   ;;  %s2355_s22 = smov 0  }
  0x12 LB: > { %2859 = sst [smem:[#allocation22_spill]] %s2245_s17  ;;  %s2376_s23 = sadd.s32 4294967295, %s2265_s22   ;;  %s2265_s22 = sphi %s2355_s22, %s32_s22   ;;  %s2261_s21 = sphi %s2353_s21, %s2908_s21   ;;  %s2257_s20 = sphi %s2351_s20, %s2907_s20   ;;  %s2253_s19 = sphi %s2349_s19, %s2911_s19   ;;  %s2249_s18 = sphi %s2347_s18, %s2910_s18   ;;  %s2245_s17 = sphi %s2345_s17, %s2909_s17  }
  0x13   : > { %2860 = sst [smem:[#allocation23_spill]] %s2257_s20  ;;  %s1647_s24 = sadd.s32 4294967294, %s2265_s22  }
  0x14   : > { %2861 = sst [smem:[#allocation24_spill]] %s2261_s21  ;;  %p66_p0 = scmp.ne.s32.totalorder %s2249_s18, %s2245_s17 }
  0x15   : > { %2862 = sst [smem:[#allocation25_spill]] %s2265_s22  ;;  %p2829_p1 = scmp.eq.s32.totalorder %s2376_s23, 0 }
  0x16   : > { %p318_p3 = scmp.eq.s32.totalorder %s1647_s24, 1  ;;  %p1648_p5 = scmp.ge.s32.totalorder %s2265_s22, 1 }
  0x17   : > { %p2385_p4 = por %p2829_p1, %p66_p0  ;;  %p325_p7 = scmp.lt.s32.totalorder %s2265_s22, 3 }
  0x18   : > { %p2390_p6 = por %p318_p3, %p66_p0  ;;  %s2267_s28 = smov [#allocation11]  }
  0x19   : > { %s2863_s25 = scalar_select %p2385_p4, 1, 0 }
  0x1a   : > { %s2864_s26 = scalar_select %p2390_p6, 1, 0 }
  0x1b   : > { %p2395_p8 = pnand %p1648_p5, %p325_p7  ;;  %s337_s29 = sshll.u32 %s2267_s28, 4  ;;  %s338_s29 = int_to_ptr.vmem [resolvable:$true] %s337_s29 }
  0x1c   : > { %2865 = sst [smem:[#allocation26_spill]] %s2864_s26  ;;  %s44_s12 = sadd.s32 1, %s2261_s21 }
  0x1d   : > { %s2866_s27 = scalar_select %p2395_p8, 1, 0 }
  0x1e   : > { %p1871_p9 = pneg %p2395_p8  ;;  %s2868_s3 = sld [smem:[#allocation31_spill]] }
  0x20   : > { %p2404_p11 = pnand %p1871_p9, %p2829_p1 }
  0x22   : > { %s2867_s30 = scalar_select %p2404_p11, 1, 0 }
  0x23   : > { %p2417_p13 = pneg %p2404_p11 }
  0x24   : > { %s1997_s15 = scalar_lea.hbm %s2868_s3, 256 }
  0x25   : > { %p1998_p12 = scmp.ne.s32.totalorder %s2868_s3, %s1997_s15  ;;  %p2004_p5 = scmp.lt.u32.totalorder %s1997_s15, %s2868_s3 }
  0x26   : > { %s2869_s28 = scalar_select %p2417_p13, 1, 0 }
  0x27   : > { %p2000_p0 = pnand %p2417_p13, %p1998_p12 }
  0x29   : > { %p2001_p3 = pneg %p2000_p0 }
  0x2b   : > { %p2006_p7 = pnand %p2004_p5, %p2001_p3 }
  0x2d   : > { %2009 = shalt.err (!%p2006_p7)
}
  0x2e   : > { %s2010_s13 = scalar_lea.vmem %s338_s29, 256  ;;  %p2018_p2 = scmp.lt.s32.totalorder %s338_s29, %s338_s29 }
  0x2f   : > { %p2011_p9 = scmp.ne.s32.totalorder %s338_s29, %s2010_s13  ;;  %p2019_p6 = scmp.lt.s32.totalorder %s2010_s13, %s2010_s13 }
  0x31   : > { %p2013_p10 = pnand %p2011_p9, %p2417_p13  ;;  %p2020_p4 = por %p2019_p6, %p2018_p2 }
  0x33   : > { %p2014_p1 = pneg %p2013_p10 }
  0x35   : > { %p2021_p8 = pnand %p2020_p4, %p2014_p1 }
  0x37   : > { %2024 = shalt.err (!%p2021_p8)
}
  0x38   : > { %s2833_s14 = smov 64   ;;  %s2834_s17 = smov 4  }
  0x39   : > { %1874 = dma.hbm_to_vmem [thread:$0]  (!%p2404_p11), %s2868_s3, 256, %s338_s29, [#allocation12], %s2833_s14, %s2833_s14, %s2834_s17  }
  0x3a   : > { %p46_p1 = scmp.ge.s32.totalorder %s44_s12, 2  ;;  %s53_s16 = sadd.s32 1, %s2253_s19 }
  0x3b   : > { %p60_p2 = scmp.ne.s32.totalorder %s2253_s19, %s2249_s18  ;;  %p61_p4 = scmp.eq.s32.totalorder %s2265_s22, 0 }
  0x3c   : > { %s2913_s12 = smov (%p46_p1, %s44_s12), 0  ;;  %p2871_p8 = scmp.eq.s32.totalorder %s2376_s23, 1 }
  0x3d   : > { %2870 = sst [smem:[#allocation27_spill]] %s2913_s12  ;;  %p62_p6 = por %p61_p4, %p60_p2 }
  0x3e   : > { %p2444_p10 = por %p2871_p8, %p60_p2  ;;  %s48_s13 = ssub.s32 %s2261_s21, %s2913_s12 }
  0x3f   : > { %p1898_p12 = scmp.lt.s32.totalorder %s2265_s22, 2  ;;  %p51_p0 = scmp.eq.s32.totalorder %s48_s13, 0 }
  0x40   : > { %s2872_s24 = scalar_select %p2444_p10, 1, 0 }
  0x41   : > { %s2836_s11 = sand.u32 1, %s2253_s19   ;;  %s2457_s26 = sshll.u32 %s2261_s21, 6 }
  0x42   : > { %2873 = sst [smem:[#allocation28_spill]] %s2872_s24  ;;  %s2454_s29 = sshll.u32 %s2836_s11, 2 }
  0x43   : > { %s2460_s15 = scalar_select %p51_p0, %s2253_s19, %s53_s16  }
  0x44   : > { %p2462_p3 = pnand %p1898_p12, %p62_p6  ;;  %s409_s17 = sand.u32 1, %s2265_s22  }
  0x45   : > { %2874 = sst [smem:[#allocation29_spill]] %s2460_s15  ;;  %s2876_s1 = sld [smem:[#allocation30_spill]] }
  0x46   : > { %s2875_s14 = scalar_select %p2462_p3, 1, 0 }
  0x47   : > { %s413_s11 = scalar_lea.vmem [#allocation8], %s2454_s29  ;;  %s2270_s16 = smov [#allocation13]  }
  0x48   : > { %s420_s21 = sshll.u32 %s413_s11, 4  ;;  %s2476_s15 = sshll.u32 %s2270_s16, 4  ;;  %s2474_s21 = int_to_ptr.vmem [resolvable:$true] %s420_s21  ;;  %s360_s15 = int_to_ptr.vmem [resolvable:$true] %s2476_s15 }
  0x49   : > { %s2478_s24 = scalar_lea.sflag [#allocation9], %s409_s17  ;;  %p2484_p7 = pneg %p2462_p3 }
  0x4b   : > { %s2471_s13 = scalar_lea.hbm %s2876_s1, %s2457_s26  ;;  %s2030_s22 = scalar_lea.hbm %s2876_s1, 128 }
  0x4c   : > { %s2025_s10 = scalar_lea.hbm %s2471_s13, 64  ;;  %p2031_p2 = scmp.lt.u32.totalorder %s2471_s13, %s2876_s1 }
  0x4d   : > { %p2026_p5 = scmp.ne.s32.totalorder %s2471_s13, %s2025_s10  ;;  %p2032_p4 = scmp.lt.u32.totalorder %s2030_s22, %s2025_s10 }
  0x4e   : > { %s2877_s3 = scalar_select %p2484_p7, 1, 0 }
  0x4f   : > { %p2028_p9 = pnand %p2484_p7, %p2026_p5  ;;  %p2033_p6 = por %p2032_p4, %p2031_p2 }
  0x50   : > { %p2034_p8 = scmp.lt.u32.totalorder %s2025_s10, %s2471_s13 }
  0x51   : > { %p2029_p1 = pneg %p2028_p9 }
  0x52   : > { %p2035_p12 = por %p2034_p8, %p2033_p6 }
  0x54   : > { %p2036_p0 = pnand %p2035_p12, %p2029_p1 }
  0x56   : > { %2039 = shalt.err (!%p2036_p0)
}
  0x57   : > { %s2040_s17 = scalar_lea.vmem %s2474_s21, 64  ;;  %s2271_s12 = smov [#allocation8]  }
  0x58   : > { %p2041_p5 = scmp.ne.s32.totalorder %s2474_s21, %s2040_s17  ;;  %s2045_s11 = sshll.u32 %s2271_s12, 4  ;;  %s2046_s11 = int_to_ptr.vmem [resolvable:$false] %s2045_s11 }
  0x59   : > { %s2047_s20 = scalar_lea.vmem %s2046_s11, 128  ;;  %p2048_p11 = scmp.lt.s32.totalorder %s2474_s21, %s2046_s11 }
  0x5a   : > { %p2043_p9 = pnand %p2041_p5, %p2484_p7  ;;  %p2049_p13 = scmp.lt.s32.totalorder %s2047_s20, %s2040_s17 }
  0x5c   : > { %p2044_p10 = pneg %p2043_p9  ;;  %p2050_p2 = por %p2049_p13, %p2048_p11 }
  0x5e   : > { %p2051_p4 = pnand %p2050_p2, %p2044_p10 }
  0x60   : > { %2054 = shalt.err (!%p2051_p4)
}
  0x61   : > { %1887 = dma.hbm_to_vmem [thread:$0]  (!%p2462_p3), %s2471_s13, 64, %s2474_s21, %s2478_s24  }
  0x62   : > { %s2055_s16 = scalar_lea.hbm %s2822_s7, 256  ;;  %p2878_p11 = scmp.ne.s32.totalorder %s2869_s28, 0 }
  0x63   : > { %p2056_p1 = scmp.ne.s32.totalorder %s2822_s7, %s2055_s16  ;;  %p2062_p6 = scmp.lt.u32.totalorder %s2055_s16, %s2822_s7 }
  0x65   : > { %p2058_p13 = pnand %p2056_p1, %p2878_p11 }
  0x67   : > { %p2059_p10 = pneg %p2058_p13 }
  0x69   : > { %p2064_p8 = pnand %p2062_p6, %p2059_p10 }
  0x6b   : > { %2067 = shalt.err (!%p2064_p8)
}
  0x6c   : > { %s2068_s20 = scalar_lea.vmem %s360_s15, 256  ;;  %p2076_p9 = scmp.lt.s32.totalorder %s360_s15, %s360_s15 }
  0x6d   : > { %p2069_p12 = scmp.ne.s32.totalorder %s360_s15, %s2068_s20  ;;  %p2077_p2 = scmp.lt.s32.totalorder %s2068_s20, %s2068_s20 }
  0x6f   : > { %p2071_p0 = pnand %p2069_p12, %p2878_p11  ;;  %p2078_p4 = por %p2077_p2, %p2076_p9 }
  0x71   : > { %p2072_p5 = pneg %p2071_p0 }
  0x73   : > { %p2079_p3 = pnand %p2078_p4, %p2072_p5 }
  0x75   : > { %2082 = shalt.err (!%p2079_p3)
}
  0x76   : > { %p2879_p1 = scmp.ne.s32.totalorder %s2867_s30, 0  ;;  %s2880_s1 = smov 4  }
  0x77   : > { %s2881_s21 = smov 64   ;;  %s2272_s22 = smov [#allocation14]  }
  0x78   : > { %1877 = dma.hbm_to_vmem [thread:$0]  (!%p2879_p1), %s2822_s7, 256, %s360_s15, [#allocation12], %s2881_s21, %s2881_s21, %s2880_s1  }
  0x79   : > { %s373_s16 = sshll.u32 %s2272_s22, 4  ;;  %s2083_s11 = scalar_lea.hbm %s2823_s8, 16  ;;  %s374_s16 = int_to_ptr.vmem [resolvable:$true] %s373_s16 }
  0x7a   : > { %p2084_p3 = scmp.ne.s32.totalorder %s2823_s8, %s2083_s11  ;;  %p2090_p6 = scmp.lt.u32.totalorder %s2083_s11, %s2823_s8 }
  0x7c   : > { %p2086_p13 = pnand %p2084_p3, %p2878_p11 }
  0x7e   : > { %p2087_p10 = pneg %p2086_p13 }
  0x80   : > { %p2092_p8 = pnand %p2090_p6, %p2087_p10 }
  0x82   : > { %2095 = shalt.err (!%p2092_p8)
}
  0x83   : > { %s2096_s15 = scalar_lea.vmem %s374_s16, 16  ;;  %s2103_s1 = scalar_lea.vmem %s374_s16, 32 }
  0x84   : > { %p2097_p12 = scmp.ne.s32.totalorder %s374_s16, %s2096_s15  ;;  %p2104_p9 = scmp.lt.s32.totalorder %s374_s16, %s374_s16 }
  0x85   : > { %p2105_p2 = scmp.lt.s32.totalorder %s2103_s1, %s2096_s15 }
  0x86   : > { %p2099_p0 = pnand %p2097_p12, %p2878_p11 }
  0x87   : > { %p2106_p4 = por %p2105_p2, %p2104_p9 }
  0x88   : > { %p2100_p5 = pneg %p2099_p0 }
  0x8a   : > { %p2107_p7 = pnand %p2106_p4, %p2100_p5 }
  0x8c   : > { %2110 = shalt.err (!%p2107_p7)
}
  0x8d   : > { %1880 = dma.hbm_to_vmem [thread:$0]  (!%p2879_p1), %s2823_s8, 16, %s374_s16, [#allocation15]  }
  0x8e   : > { %s2552_s28 = scalar_lea.hbm %s2815_s0, %s2457_s26  ;;  %s394_s13 = scalar_lea.vmem [#allocation5], %s2454_s29 }
  0x8f   : > { %s402_s10 = sshll.u32 %s394_s13, 4  ;;  %s2882_s30 = sand.u32 1, %s2253_s19   ;;  %s403_s10 = int_to_ptr.vmem [resolvable:$true] %s402_s10 }
  0x90   : > { %s391_s22 = scalar_lea.sflag [#allocation6], %s2882_s30  ;;  %s2111_s12 = scalar_lea.hbm %s2552_s28, 64 }
  0x91   : > { %p2112_p7 = scmp.ne.s32.totalorder %s2552_s28, %s2111_s12  ;;  %p2883_p11 = scmp.ne.s32.totalorder %s2877_s3, 0 }
  0x92   : > { %s2116_s11 = scalar_lea.hbm %s2815_s0, 128  ;;  %p2117_p1 = scmp.lt.u32.totalorder %s2552_s28, %s2815_s0 }
  0x93   : > { %p2114_p3 = pnand %p2112_p7, %p2883_p11  ;;  %p2118_p10 = scmp.lt.u32.totalorder %s2116_s11, %s2111_s12 }
  0x94   : > { %p2120_p8 = scmp.lt.u32.totalorder %s2111_s12, %s2552_s28 }
  0x95   : > { %p2115_p13 = pneg %p2114_p3  ;;  %p2119_p6 = por %p2118_p10, %p2117_p1 }
  0x97   : > { %p2121_p12 = por %p2120_p8, %p2119_p6 }
  0x99   : > { %p2122_p0 = pnand %p2121_p12, %p2115_p13 }
  0x9b   : > { %2125 = shalt.err (!%p2122_p0)
}
  0x9c   : > { %s2126_s1 = scalar_lea.vmem %s403_s10, 64  ;;  %s2273_s9 = smov [#allocation5]  }
  0x9d   : > { %p2127_p5 = scmp.ne.s32.totalorder %s403_s10, %s2126_s1  ;;  %s2131_s21 = sshll.u32 %s2273_s9, 4  ;;  %s2132_s21 = int_to_ptr.vmem [resolvable:$false] %s2131_s21 }
  0x9e   : > { %s2133_s4 = scalar_lea.vmem %s2132_s21, 128  ;;  %p2134_p4 = scmp.lt.s32.totalorder %s403_s10, %s2132_s21 }
  0x9f   : > { %p2129_p9 = pnand %p2127_p5, %p2883_p11  ;;  %p2135_p7 = scmp.lt.s32.totalorder %s2133_s4, %s2126_s1 }
  0xa1   : > { %p2130_p2 = pneg %p2129_p9  ;;  %p2136_p3 = por %p2135_p7, %p2134_p4 }
  0xa3   : > { %p2137_p1 = pnand %p2136_p3, %p2130_p2 }
  0xa5   : > { %2140 = shalt.err (!%p2137_p1)
}
  0xa6   : > { %p2884_p10 = scmp.ne.s32.totalorder %s2875_s14, 0  ;;  %s2578_s30 = scalar_lea.hbm %s2817_s2, %s2457_s26 }
  0xa7   : > { %s431_s12 = scalar_lea.vmem [#allocation10], %s2454_s29  ;;  %s2141_s17 = scalar_lea.hbm %s2578_s30, 64 }
  0xa8   : > { %1884 = dma.hbm_to_vmem [thread:$0]  (!%p2884_p10), %s2552_s28, 64, %s403_s10, %s391_s22  }
  0xa9   : > { %s438_s16 = sshll.u32 %s431_s12, 4  ;;  %p2142_p13 = scmp.ne.s32.totalorder %s2578_s30, %s2141_s17  ;;  %s439_s16 = int_to_ptr.vmem [resolvable:$true] %s438_s16 }
  0xaa   : > { %s2146_s28 = scalar_lea.hbm %s2817_s2, 128  ;;  %p2147_p12 = scmp.lt.u32.totalorder %s2578_s30, %s2817_s2 }
  0xab   : > { %p2144_p6 = pnand %p2142_p13, %p2883_p11  ;;  %p2148_p0 = scmp.lt.u32.totalorder %s2146_s28, %s2141_s17 }
  0xac   : > { %p2150_p9 = scmp.lt.u32.totalorder %s2141_s17, %s2578_s30 }
  0xad   : > { %p2145_p8 = pneg %p2144_p6  ;;  %p2149_p5 = por %p2148_p0, %p2147_p12 }
  0xaf   : > { %p2151_p2 = por %p2150_p9, %p2149_p5 }
  0xb1   : > { %p2152_p4 = pnand %p2151_p2, %p2145_p8 }
  0xb3   : > { %2155 = shalt.err (!%p2152_p4)
}
  0xb4   : > { %s2156_s29 = scalar_lea.vmem %s439_s16, 64  ;;  %s2274_s26 = smov [#allocation10]  }
  0xb5   : > { %p2157_p7 = scmp.ne.s32.totalorder %s439_s16, %s2156_s29  ;;  %s2161_s15 = sshll.u32 %s2274_s26, 4  ;;  %s2162_s15 = int_to_ptr.vmem [resolvable:$false] %s2161_s15 }
  0xb6   : > { %s2163_s1 = scalar_lea.vmem %s2162_s15, 128  ;;  %p2164_p13 = scmp.lt.s32.totalorder %s439_s16, %s2162_s15 }
  0xb7   : > { %p2159_p3 = pnand %p2157_p7, %p2883_p11  ;;  %p2165_p6 = scmp.lt.s32.totalorder %s2163_s1, %s2156_s29 }
  0xb9   : > { %p2160_p1 = pneg %p2159_p3  ;;  %p2166_p10 = por %p2165_p6, %p2164_p13 }
  0xbb   : > { %p2167_p0 = pnand %p2166_p10, %p2160_p1 }
  0xbd   : > { %2170 = shalt.err (!%p2167_p0)
}
  0xbe   : > { %p2885_p12 = scmp.ne.s32.totalorder %s2875_s14, 0  ;;  %p2886_p8 = scmp.ne.s32.totalorder %s2866_s27, 0 }
  0xbf   : > { %s2602_s3 = sand.u32 (!%p2886_p8), 1, %s2249_s18   ;;  %p2887_p11 = scmp.ne.s32.totalorder (!%p2886_p8), %s2863_s25, 0 }
  0xc0   : > { %1890 = dma.hbm_to_vmem [thread:$0]  (!%p2885_p12), %s2578_s30, 64, %s439_s16, %s2478_s24  }
  0xc1   : > { %447 = sbr.rel (%p2886_p8) target bundleno = 2671 (0xa6f), region = 64  ;;  %s2605_s9 = sshll.u32 (!%p2886_p8), %s2602_s3, 2 }
  0xc2   : > { %s450_s21 = scalar_lea.sflag (!%p2886_p8), [#allocation6], %s2602_s3  ;;  %s453_s4 = scalar_lea.vmem (!%p2886_p8), [#allocation5], %s2605_s9 }
  0xc8   : > { %2224 = dma.done.wait (%p2887_p11), %s450_s21, 64  }
  0xc9   : > { %2226 = vsyncadd (%p2887_p11), %s450_s21, 4294967232  ;;  %s458_s27 = sand.u32 1, %s2376_s23   ;;  %s462_s24 = scalar_lea.vmem [#allocation8], %s2605_s9 }
  0xca   : > { %s459_s14 = scalar_lea.sflag [#allocation9], %s458_s27 }
  0xcb   : > { %2228 = dma.done.wait (%p2887_p11), %s459_s14, 128  }
  0xcc   : > { %2230 = vsyncadd (%p2887_p11), %s459_s14, 4294967168  ;;  %s471_s6 = scalar_lea.vmem [#allocation10], %s2605_s9  ;;  %p2888_p10 = scmp.eq.s32.totalorder %s2376_s23, 0 }
  0xce   : > { %2232 = dma.done.wait (%p2888_p10), [#allocation12], 512   ;;  %p2889_p5 = pmov %p2888_p10 }
  0xd0   : > { %2234 = vsyncadd (%p2889_p5), [#allocation12], 4294966784  ;;  %p2890_p9 = pmov %p2889_p5 }
  0xd1   : > { %p2891_p2 = pmov %p2889_p5 }
  0xd2   : > { %2236 = dma.done.wait (%p2890_p9), [#allocation15], 16  }
  0xd3   : > { %2238 = vsyncadd (%p2891_p2), [#allocation15], 4294967280  ;;  %v2275_v0 = vmov 0.0   ;;  %vm2276_vm0 = vmmov 0   ;;  %v1967_v1 = vld [vmem:[%s2820_s5] sm:$0xff]   ;;  %v1968_v2 = vld [vmem:[%s2820_s5 + $0x8] sm:$0xff]  }
  0xd4   : > { %1747 = vmatprep.subr.bf16.mxu0 %v2275_v0  ;;  %1751 = vmatprep.mubr.msk.bf16.mxu0 %vm2276_vm0, %v2275_v0  ;;  %v538_v3 = vld [vmem:[%s462_s24] sm:$0xf]  ;;  %vm563_vm1 = vcmask 261120   ;;  %v1969_v4 = vld [vmem:[#allocation11] sm:$0xff]   ;;  %v1970_v5 = vld [vmem:[#allocation11 + $0x8] sm:$0xff]   ;;  %s2892_s17 = sld [smem:[#allocation33_spill]] }
  0xd5   : > { %1755 = vmatprep.subr.bf16.mxu1 %v2275_v0  ;;  %1759 = vmatprep.mubr.msk.bf16.mxu1 %vm2276_vm0, %v2275_v0  ;;  %v678_v6 = vld [vmem:[%s453_s4] sm:$0xf]  ;;  %v1971_v7 = vld [vmem:[#allocation13] sm:$0xff]   ;;  %v1972_v8 = vld [vmem:[#allocation13 + $0x8] sm:$0xff]   ;;  %vm674_vm2 = vcmask 257024   ;;  %s2893_s28 = sld [smem:[#allocation32_spill]] }
  0xd6   : > { %1748 = vmatpush3.bf16.msra.mxu0 %v1967_v1  ;;  %1756 = vmatpush3.bf16.msra.mxu1 %v1971_v7  ;;  %v539_v9 = vld [vmem:[%s471_s6] sm:$0xf]  ;;  %vm749_vm3 = vcmask 64512   ;;  %s2277_s10 = smov 120   ;;  %v1671_v26 = vld [vmem:[#allocation14] ss:$0 sm:$0xff] }
  0xd7   : > { %1749 = vmatprep.subr.bf16.mxu0 %v2275_v0  ;;  %1757 = vmatprep.subr.bf16.mxu1 %v2275_v0  ;;  %vm806_vm4 = vcmask 1043456   ;;  %v2278_v42 = vmov 0   ;;  %s2279_s22 = smov 112   ;;  %s2280_s29 = smov 104   ;;  %vm901_vm5 = vcmask 60416   ;;  %vm1071_vm6 = vcmask 126016  }
  0xd8   : > { %v2680_v43 = vsel %vm806_vm4, 1065369472, %v2278_v42  ;;  %1965 = vset.pattern.permute.xlu0 %v2278_v42  ;;  %1966 = vset.pattern.permute.xlu1 %v2278_v42  ;;  %s2281_s26 = smov 8   ;;  %s2282_s15 = smov 16   ;;  %vm1240_vm7 = vcmask 191616   ;;  %vm1409_vm8 = vcmask 257216  }
  0xd9   : > { %s2894_s21 = sld [smem:[#allocation34_spill]]  ;;  %s2896_s24 = sld [smem:[#allocation23_spill]] }
  0xda   : > { %1750 = vmatpush3.bf16.msra.mxu0 %v1968_v2  ;;  %1758 = vmatpush3.bf16.msra.mxu1 %v1972_v8  ;;  %v1667_v10 = vld [vmem:[%s2892_s17] ss:$0 sm:$0xff]  ;;  %s2283_s6 = smov 24   ;;  %s1666_s25 = sshll.u32 %s2602_s3, 3 }
  0xdb   : > { %1763 = vmatprep.subr.bf16.mxu0 %v2275_v0  ;;  %1771 = vmatprep.subr.bf16.mxu1 %v2275_v0  ;;  %v1675_v17 = vld [vmem:[%s2893_s28] ss:$0 sm:$0xff]  ;;  %s2897_s30 = sld [smem:[#allocation35_spill]]  ;;  %s2898_s12 = sld [smem:[#allocation28_spill]] }
  0xdc   : > { %s531_s17 = scalar_lea.vmem [#allocation16], %s1666_s25 }
  0xdd   : > { %1752 = vmatmul.mubr.msk.bf16.vlgmr.msra.gmra.mrb[0].mxu0 %vm563_vm1, %v538_v3  ;;  %1760 = vmatmul.mubr.msk.bf16.vlgmr.msra.gmra.mrb[0].mxu1 %vm563_vm1, %v539_v9  ;;  %s1494_s11 = sshll.u32 %s531_s17, 4  ;;  %s2767_s11 = int_to_ptr.vmem [resolvable:$true] %s1494_s11 }
  0xde   : > { %1764 = vmatpush3.bf16.msra.mxu0 %v1969_v4  ;;  %1767 = vmatprep.mubr.msk.bf16.mxu0 %vm2276_vm0, %v2275_v0 }
  0xdf   : > { %1765 = vmatprep.subr.bf16.mxu0 %v2275_v0  ;;  %1773 = vmatprep.mubr.msk.bf16.mxu1 %vm2276_vm0, %v2275_v0  ;;  %s2895_s4 = smov %s2894_s21  ;;  %s1705_s16 = sshll.u32 %s2896_s24, 7 }
  0xe1   : > { %p2900_p7 = scmp.ne.s32.totalorder %s2898_s12, 0 }
  0xe2   : > { %1766 = vmatpush3.bf16.msra.mxu0 %v1970_v5 }
  0xe3   : > { %1777 = vmatprep.subr.bf16.mxu0 %v2275_v0 }
  0xe5   : > { %1768 = vmatmul.mubr.msk.bf16.vlgmr.msra.gmra.mrb[4].mxu0 %vm563_vm1, %v678_v6 }
  0xe6   : > { %1779 = vmatprep.mubr.msk.bf16.mxu0 %vm2276_vm0, %v2275_v0 }
 0x1b0   : > { %v601_v11 = vpop.f32.mrb[0].mxu0  ;;  %v667_v27 = vpop.f32.mrb[0].mxu1 }
 0x1b1   : > { %v602_v12 = vadd.f32 %v1667_v10, %v601_v11  ;;  %v1753_v13 = vpop.f32.mrb[1].mxu0  ;;  %v668_v28 = vadd.f32 %v1671_v26, %v667_v27  ;;  %v1761_v29 = vpop.f32.mrb[1].mxu1 }
 0x1b2   : > { %v604_v14 = vpop.f32.mrb[2].mxu0  ;;  %v670_v30 = vpop.f32.mrb[2].mxu1 }
 0x1b3   : > { %v673_v15 = vpack.c.bf16 %v602_v12, %v602_v12  ;;  %v1754_v16 = vpop.f32.mrb[3].mxu0  ;;  %v676_v31 = vpack.c.bf16 %v668_v28, %v668_v28  ;;  %v1762_v32 = vpop.f32.mrb[3].mxu1 }
 0x1b5   : > { %675 = vst.msk [vmem:[#allocation2] sm:$0xf] %vm674_vm2, %v673_v15  ;;  %677 = vst.msk [vmem:[#allocation3] sm:$0xf] %vm674_vm2, %v676_v31 }
 0x1b8   : > { %v740_v18 = vpop.f32.mrb[4].mxu0 }
 0x1b9   : > { %v741_v19 = vadd.f32 %v1675_v17, %v740_v18  ;;  %v1769_v20 = vpop.f32.mrb[5].mxu0 }
 0x1ba   : > { %v743_v21 = vpop.f32.mrb[6].mxu0 }
 0x1bb   : > { %v2666_v22 = vpack.c.bf16 %v741_v19, %v741_v19  ;;  %v1770_v23 = vpop.f32.mrb[7].mxu0 }
 0x1bc   : > { %v747_v24 = vld [vmem:[#allocation2] sm:$0xf]  ;;  %v748_v33 = vld [vmem:[#allocation3] sm:$0xf] }
 0x1bd   : > { %v754_v25 = vsel %vm749_vm3, %v747_v24, 0  ;;  %906 = vrot.lane.b32.xlu1 %v2666_v22, %s2277_s10  ;;  %v808_v34 = vsel %vm806_vm4, %v748_v33, 0  ;;  %v1973_v40 = vld [vmem:[#allocation2] ss:$0 sps:$4 sm:$0xff]   ;;  %v1974_v41 = vld [vmem:[#allocation3] ss:$0 sps:$4 sm:$0xff]  }
 0x1be   : > { %1772 = vmatpush3.bf16.xpose.msra.mxu1 %v754_v25  ;;  %1778 = vmatpush3.bf16.msra.mxu0 %v808_v34  ;;  %v1975_v44 = vld [vmem:[#allocation2] ss:$0 sps:$4 sm:$0xff]   ;;  %v1976_v5 = vld [vmem:[#allocation3] ss:$0 sps:$4 sm:$0xff]  }
 0x1bf   : > { %1783 = vmatprep.subr.bf16.mxu1 %v2275_v0  ;;  %1789 = vmatprep.subr.bf16.mxu0 %v2275_v0  ;;  %v1977_v6 = vld [vmem:[#allocation2] ss:$0 sps:$4 sm:$0xff]   ;;  %v1978_v30 = vld [vmem:[#allocation3] ss:$0 sps:$4 sm:$0xff]  }
 0x1c5   : > { %1774 = vmatmul.mubr.msk.bf16.vlgmr.msra.gmra.mrb[4].mxu1 %vm749_vm3, %v2666_v22 }
 0x1c6   : > { %1785 = vmatprep.mubr.msk.bf16.mxu1 %vm2276_vm0, %v2275_v0  ;;  %1784 = vmatpush3.bf16.msra.mxu1 %v2680_v43 }
 0x1c7   : > { %1795 = vmatprep.subr.bf16.mxu1 %v2275_v0 }
 0x22f   : > { %v907_v54 = vpop.permute.xlu1 %906 }
 0x298   : > { %v790_v35 = vpop.f32.mrb[4].mxu1 }
 0x299   : > { %v1775_v36 = vpop.f32.mrb[5].mxu1  ;;  %v796_v37 = vsel %vm749_vm3, %v790_v35, -inf }
 0x29a   : > { %797 = vmax.xlane.f32.xlu0 %v796_v37  ;;  %v793_v38 = vpop.f32.mrb[6].mxu1 }
 0x29b   : > { %v1776_v39 = vpop.f32.mrb[7].mxu1 }
 0x2b0   : > { %911 = vrot.lane.b32.xlu0 %v1973_v40, %s2277_s10 }
 0x2b4   : > { %969 = vrot.lane.b32.xlu0 %v1974_v41, %s2277_s10  ;;  %s2899_s10 = sld [smem:[#allocation36_spill]] }
 0x2b8   : > { %1080 = vrot.lane.b32.xlu0 %v1975_v44, %s2279_s22 }
 0x2bc   : > { %1075 = vrot.lane.b32.xlu0 %v2666_v22, %s2279_s22 }
 0x327   : > { %v798_v45 = vpop.xlane.xlu0 %797 }
 0x328   : > { %v799_v46 = vsub.f32 %v790_v35, %v798_v45 }
 0x32a   : > { %v800_v47 = vmul.f32 1.442695, %v799_v46 }
 0x32b   : > { %v912_v48 = vpop.permute.xlu0 %911 }
 0x32c   : > { %1981 = vpow2.f32 %v800_v47  ;;  %v917_v52 = vsel %vm749_vm3, %v912_v48, 0 }
 0x32f   : > { %v970_v50 = vpop.permute.xlu0 %969 }
 0x330   : > { %v975_v53 = vsel %vm806_vm4, %v970_v50, 0 }
 0x333   : > { %v1081_v11 = vpop.permute.xlu0 %1080 }
 0x334   : > { %v1086_v14 = vsel %vm749_vm3, %v1081_v11, 0 }
 0x336   : > { %v1982_v49 = vpop.eup %1981 }
 0x337   : > { %v802_v51 = vpack.c.bf16 %v1982_v49, %v1982_v49  ;;  %v1076_v16 = vpop.permute.xlu0 %1075 }
 0x339   : > { %1780 = vmatmul.mubr.msk.bf16.vlgmr.msra.gmra.mrb[8].mxu0 %vm749_vm3, %v802_v51  ;;  %1786 = vmatmul.mubr.msk.bf16.vlgmr.msra.gmra.mrb[8].mxu1 %vm749_vm3, %v802_v51 }
 0x33a   : > { %1790 = vmatpush3.bf16.xpose.msra.mxu0 %v917_v52  ;;  %1796 = vmatpush3.bf16.msra.mxu1 %v975_v53 }
 0x33b   : > { %1791 = vmatprep.mubr.msk.bf16.mxu0 %vm2276_vm0, %v2275_v0  ;;  %1801 = vmatprep.subr.bf16.mxu0 %v2275_v0 }
 0x33c   : > { %1797 = vmatprep.mubr.msk.bf16.mxu1 %vm2276_vm0, %v2275_v0  ;;  %1807 = vmatprep.subr.bf16.mxu1 %v2275_v0 }
 0x341   : > { %1792 = vmatmul.mubr.msk.bf16.vlgmr.msra.gmra.mrb[12].mxu0 %vm749_vm3, %v907_v54 }
 0x342   : > { %1802 = vmatpush3.bf16.msra.mxu0 %v2680_v43  ;;  %1803 = vmatprep.mubr.msk.bf16.mxu0 %vm2276_vm0, %v2275_v0 }
 0x343   : > { %1813 = vmatprep.subr.bf16.mxu0 %v2275_v0 }
 0x40c   : > { %v2702_v55 = vpop.f32.mrb[8].mxu0  ;;  %v2704_v56 = vpop.f32.mrb[8].mxu1 }
 0x40d   : > { %v1781_v57 = vpop.f32.mrb[9].mxu0  ;;  %v1787_v58 = vpop.f32.mrb[9].mxu1 }
 0x40e   : > { %v847_v59 = vpop.f32.mrb[10].mxu0  ;;  %v890_v60 = vpop.f32.mrb[10].mxu1 }
 0x40f   : > { %v1782_v61 = vpop.f32.mrb[11].mxu0  ;;  %v1788_v62 = vpop.f32.mrb[11].mxu1 }
 0x414   : > { %v953_v63 = vpop.f32.mrb[12].mxu0 }
 0x415   : > { %v1793_v1 = vpop.f32.mrb[13].mxu0  ;;  %v959_v2 = vsel %vm749_vm3, %v953_v63, -inf }
 0x416   : > { %960 = vmax.xlane.f32.xlu1 %v959_v2  ;;  %v956_v3 = vpop.f32.mrb[14].mxu0 }
 0x417   : > { %v1794_v4 = vpop.f32.mrb[15].mxu0 }
 0x427   : > { %1138 = vrot.lane.b32.xlu1 %v1976_v5, %s2279_s22  ;;  %s2765_s22 = scalar_lea.hbm %s2899_s10, %s1705_s16 }
 0x42b   : > { %1249 = vrot.lane.b32.xlu1 %v1977_v6, %s2280_s29 }
 0x42f   : > { %1244 = vrot.lane.b32.xlu1 %v2666_v22, %s2280_s29 }
 0x4a3   : > { %v961_v7 = vpop.xlane.xlu1 %960 }
 0x4a4   : > { %v962_v8 = vsub.f32 %v953_v63, %v961_v7 }
 0x4a6   : > { %v963_v9 = vmul.f32 1.442695, %v962_v8 }
 0x4a7   : > { %v1139_v12 = vpop.permute.xlu1 %1138 }
 0x4a8   : > { %1983 = vpow2.f32 %v963_v9  ;;  %v1144_v15 = vsel %vm806_vm4, %v1139_v12, 0 }
 0x4ab   : > { %v1250_v36 = vpop.permute.xlu1 %1249 }
 0x4ac   : > { %v1255_v39 = vsel %vm749_vm3, %v1250_v36, 0 }
 0x4af   : > { %v1245_v41 = vpop.permute.xlu1 %1244 }
 0x4b2   : > { %v1984_v10 = vpop.eup %1983 }
 0x4b3   : > { %v965_v13 = vpack.c.bf16 %v1984_v10, %v1984_v10 }
 0x4b5   : > { %1798 = vmatmul.mubr.msk.bf16.vlgmr.msra.gmra.mrb[12].mxu1 %vm749_vm3, %v965_v13  ;;  %1804 = vmatmul.mubr.msk.bf16.vlgmr.msra.gmra.mrb[16].mxu0 %vm749_vm3, %v965_v13 }
 0x4b6   : > { %1808 = vmatpush3.bf16.xpose.msra.mxu1 %v1086_v14  ;;  %1814 = vmatpush3.bf16.msra.mxu0 %v1144_v15 }
 0x4b7   : > { %1809 = vmatprep.mubr.msk.bf16.mxu1 %vm2276_vm0, %v2275_v0  ;;  %1819 = vmatprep.subr.bf16.mxu1 %v2275_v0 }
 0x4b8   : > { %1815 = vmatprep.mubr.msk.bf16.mxu0 %vm2276_vm0, %v2275_v0  ;;  %1825 = vmatprep.subr.bf16.mxu0 %v2275_v0 }
 0x4bd   : > { %1810 = vmatmul.mubr.msk.bf16.vlgmr.msra.gmra.mrb[16].mxu1 %vm749_vm3, %v1076_v16 }
 0x4be   : > { %1820 = vmatpush3.bf16.msra.mxu1 %v2680_v43  ;;  %1821 = vmatprep.mubr.msk.bf16.mxu1 %vm2276_vm0, %v2275_v0 }
 0x4bf   : > { %1831 = vmatprep.subr.bf16.mxu1 %v2275_v0 }
 0x588   : > { %v1011_v17 = vpop.f32.mrb[12].mxu1  ;;  %v1051_v18 = vpop.f32.mrb[16].mxu0 }
 0x589   : > { %v1799_v19 = vpop.f32.mrb[13].mxu1  ;;  %v1805_v20 = vpop.f32.mrb[17].mxu0  ;;  %1985 = vrcp.f32 %v1051_v18 }
 0x58a   : > { %v1014_v21 = vpop.f32.mrb[14].mxu1  ;;  %v1054_v22 = vpop.f32.mrb[18].mxu0  ;;  %v1979_v19 = vld [vmem:[%s2894_s21] sm:$0xff]   ;;  %v1980_v20 = vld [vmem:[%s2895_s4 + $0x8] sm:$0xff]  }
 0x58b   : > { %v1800_v23 = vpop.f32.mrb[15].mxu1  ;;  %v1806_v24 = vpop.f32.mrb[19].mxu0 }
 0x590   : > { %v1122_v25 = vpop.f32.mrb[16].mxu1 }
 0x591   : > { %v1811_v26 = vpop.f32.mrb[17].mxu1  ;;  %v1128_v27 = vsel %vm749_vm3, %v1122_v25, -inf }
 0x592   : > { %1129 = vmax.xlane.f32.xlu0 %v1128_v27  ;;  %v1125_v28 = vpop.f32.mrb[18].mxu1  ;;  %v1700_v26 = vld [vmem:[%s2897_s30] ss:$0 sm:$0xff] }
 0x593   : > { %v1812_v29 = vpop.f32.mrb[19].mxu1  ;;  %v1986_v31 = vpop.eup %1985 }
 0x5a8   : > { %1307 = vrot.lane.b32.xlu0 %v1978_v30, %s2280_s29  ;;  %s1480_s29 = scalar_lea.sflag [#allocation7], %s2602_s3 }
 0x5ac   : > { %1060 = vperm.xlu0 %1965, %v1986_v31  }
 0x61f   : > { %v1130_v32 = vpop.xlane.xlu0 %1129 }
 0x620   : > { %v1131_v33 = vsub.f32 %v1122_v25, %v1130_v32 }
 0x622   : > { %v1132_v34 = vmul.f32 1.442695, %v1131_v33 }
 0x623   : > { %v1308_v37 = vpop.permute.xlu0 %1307 }
 0x624   : > { %1987 = vpow2.f32 %v1132_v34  ;;  %v1313_v40 = vsel %vm806_vm4, %v1308_v37, 0 }
 0x62b   : > { %v1061_v57 = vpop.permute.xlu0 %1060 }
 0x62c   : > { %v1063_v59 = vmul.f32 %v1061_v57, %v1011_v17 }
 0x62e   : > { %v1988_v35 = vpop.eup %1987  ;;  %v1708_v61 = vpack.c.bf16 %v1063_v59, %v1063_v59 }
 0x62f   : > { %v1134_v38 = vpack.c.bf16 %v1988_v35, %v1988_v35 }
 0x631   : > { %1816 = vmatmul.mubr.msk.bf16.vlgmr.msra.gmra.mrb[20].mxu0 %vm749_vm3, %v1134_v38  ;;  %1822 = vmatmul.mubr.msk.bf16.vlgmr.msra.gmra.mrb[20].mxu1 %vm749_vm3, %v1134_v38 }
 0x632   : > { %1826 = vmatpush3.bf16.xpose.msra.mxu0 %v1255_v39  ;;  %1832 = vmatpush3.bf16.msra.mxu1 %v1313_v40 }
 0x633   : > { %1827 = vmatprep.mubr.msk.bf16.mxu0 %vm2276_vm0, %v2275_v0  ;;  %1837 = vmatprep.subr.bf16.mxu0 %v2275_v0 }
 0x634   : > { %1833 = vmatprep.mubr.msk.bf16.mxu1 %vm2276_vm0, %v2275_v0  ;;  %1843 = vmatprep.subr.bf16.mxu1 %v2275_v0 }
 0x639   : > { %1828 = vmatmul.mubr.msk.bf16.vlgmr.msra.gmra.mrb[24].mxu0 %vm749_vm3, %v1245_v41 }
 0x63a   : > { %1838 = vmatpush3.bf16.msra.mxu0 %v2680_v43  ;;  %1839 = vmatprep.mubr.msk.bf16.mxu0 %vm2276_vm0, %v2275_v0 }
 0x704   : > { %v1180_v42 = vpop.f32.mrb[20].mxu0  ;;  %v1220_v44 = vpop.f32.mrb[20].mxu1 }
 0x705   : > { %1989 = vrcp.f32 %v1220_v44  ;;  %v1817_v45 = vpop.f32.mrb[21].mxu0  ;;  %v1823_v46 = vpop.f32.mrb[21].mxu1 }
 0x706   : > { %v1183_v47 = vpop.f32.mrb[22].mxu0  ;;  %v1223_v48 = vpop.f32.mrb[22].mxu1  ;;  %1991 = vrcp.f32 %v2704_v56 }
 0x707   : > { %v1818_v49 = vpop.f32.mrb[23].mxu0  ;;  %v1824_v50 = vpop.f32.mrb[23].mxu1 }
 0x70c   : > { %v1291_v51 = vpop.f32.mrb[24].mxu0 }
 0x70d   : > { %v1829_v52 = vpop.f32.mrb[25].mxu0  ;;  %v1297_v53 = vsel %vm749_vm3, %v1291_v51, -inf }
 0x70e   : > { %1298 = vmax.xlane.f32.xlu1 %v1297_v53  ;;  %v1294_v43 = vpop.f32.mrb[26].mxu0 }
 0x70f   : > { %v1990_v54 = vpop.eup %1989  ;;  %v1830_v58 = vpop.f32.mrb[27].mxu0 }
 0x710   : > { %1229 = vperm.xlu0 %1965, %v1990_v54   ;;  %v1992_v60 = vpop.eup %1991 }
 0x714   : > { %896 = vperm.xlu0 %1965, %v1992_v60  }
 0x718   : > { %1068 = vrot.lane.b32.xlu0 %v1708_v61, %s2281_s26  ;;  %s2171_s26 = scalar_lea.vmem %s2767_s11, 128 }
 0x719   : > { %p2172_p4 = scmp.ne.s32.totalorder %s2767_s11, %s2171_s26 }
 0x71b   : > { %p2173_p3 = pnand %p2172_p4, %p2900_p7 }
 0x71d   : > { %p2174_p1 = pneg %p2173_p3 }
 0x78f   : > { %v1230_v62 = vpop.permute.xlu0 %1229 }
 0x790   : > { %v1232_v63 = vmul.f32 %v1230_v62, %v1180_v42 }
 0x792   : > { %v1709_v1 = vpack.c.bf16 %v1232_v63, %v1232_v63 }
 0x793   : > { %v897_v56 = vpop.permute.xlu0 %896 }
 0x794   : > { %v899_v2 = vmul.f32 %v897_v56, %v2702_v55  ;;  %1237 = vrot.lane.b32.xlu0 %v1709_v1, %s2282_s15  ;;  %s2284_s15 = smov [#allocation16]  }
 0x795   : > { %s2175_s1 = sshll.u32 %s2284_s15, 4  ;;  %s2176_s1 = int_to_ptr.vmem [resolvable:$false] %s2175_s1 }
 0x796   : > { %v900_v3 = vpack.c.bf16 %v899_v2, %v899_v2  ;;  %s2177_s9 = scalar_lea.vmem %s2176_s1, 256  ;;  %p2178_p13 = scmp.lt.s32.totalorder %s2767_s11, %s2176_s1 }
 0x797   : > { %v1069_v4 = vpop.permute.xlu0 %1068  ;;  %p2179_p6 = scmp.lt.s32.totalorder %s2177_s9, %s2171_s26 }
 0x798   : > { %902 = vst.msk [vmem:[#allocation4] sm:$0xf] %vm901_vm5, %v900_v3 }
 0x799   : > { %1072 = vst.msk [vmem:[#allocation4] sm:$0xf] %vm1071_vm6, %v1069_v4  ;;  %p2180_p0 = por %p2179_p6, %p2178_p13 }
 0x79b   : > { %v1299_v5 = vpop.xlane.xlu1 %1298  ;;  %p2181_p12 = pnand %p2180_p0, %p2174_p1 }
 0x79c   : > { %v1300_v6 = vsub.f32 %v1291_v51, %v1299_v5 }
 0x79e   : > { %v1301_v7 = vmul.f32 1.442695, %v1300_v6 }
 0x7a0   : > { %1993 = vpow2.f32 %v1301_v7 }
 0x7aa   : > { %v1994_v8 = vpop.eup %1993 }
 0x7ab   : > { %v1303_v9 = vpack.c.bf16 %v1994_v8, %v1994_v8 }
 0x7ad   : > { %1834 = vmatmul.mubr.msk.bf16.vlgmr.msra.gmra.mrb[24].mxu1 %vm749_vm3, %v1303_v9  ;;  %1840 = vmatmul.mubr.msk.bf16.vlgmr.msra.gmra.mrb[28].mxu0 %vm749_vm3, %v1303_v9 }
 0x7ae   : > { %1847 = vmatprep.mubr.msk.bf16.mxu1 %vm2276_vm0, %v2275_v0  ;;  %1844 = vmatpush3.bf16.msra.mxu1 %v1979_v19 }
 0x7af   : > { %1845 = vmatprep.subr.bf16.mxu1 %v2275_v0 }
 0x7b2   : > { %1846 = vmatpush3.bf16.msra.mxu1 %v1980_v20 }
 0x806   : > { %v1238_v55 = vpop.permute.xlu0 %1237 }
 0x807   : > { %1241 = vst.msk [vmem:[#allocation4] sm:$0xf] %vm1240_vm7, %v1238_v55 }
 0x880   : > { %v1349_v10 = vpop.f32.mrb[24].mxu1  ;;  %v1389_v11 = vpop.f32.mrb[28].mxu0 }
 0x881   : > { %1995 = vrcp.f32 %v1389_v11  ;;  %v1835_v12 = vpop.f32.mrb[25].mxu1  ;;  %v1841_v13 = vpop.f32.mrb[29].mxu0 }
 0x882   : > { %v1352_v14 = vpop.f32.mrb[26].mxu1  ;;  %v1392_v15 = vpop.f32.mrb[30].mxu0 }
 0x883   : > { %v1836_v16 = vpop.f32.mrb[27].mxu1  ;;  %v1842_v17 = vpop.f32.mrb[31].mxu0 }
 0x88b   : > { %v1996_v18 = vpop.eup %1995 }
 0x88c   : > { %1398 = vperm.xlu1 %1966, %v1996_v18  }
 0x90b   : > { %v1399_v21 = vpop.permute.xlu1 %1398 }
 0x90c   : > { %v1401_v22 = vmul.f32 %v1399_v21, %v1349_v10 }
 0x90e   : > { %v1710_v23 = vpack.c.bf16 %v1401_v22, %v1401_v22 }
 0x910   : > { %1406 = vrot.lane.b32.xlu0 %v1710_v23, %s2283_s6 }
 0x982   : > { %v1407_v24 = vpop.permute.xlu0 %1406 }
 0x983   : > { %1410 = vst.msk [vmem:[#allocation4] sm:$0xf] %vm1409_vm8, %v1407_v24 }
 0x98a   : > { %v1411_v25 = vld [vmem:[#allocation4] sm:$0xf] }
 0x98b   : > { %1848 = vmatmul.mubr.msk.bf16.vlgmr.msra.gmra.mrb[28].mxu1 %vm563_vm1, %v1411_v25 }
 0xa5e   : > { %v1472_v0 = vpop.f32.mrb[28].mxu1 }
 0xa5f   : > { %v1473_v27 = vadd.f32 %v1700_v26, %v1472_v0  ;;  %v1849_v28 = vpop.f32.mrb[29].mxu1 }
 0xa60   : > { %v1475_v29 = vpop.f32.mrb[30].mxu1 }
 0xa61   : > { %v1850_v30 = vpop.f32.mrb[31].mxu1  ;;  %1478 = vst.msk [vmem:[%s531_s17] sm:$0xff] %vm563_vm1, %v1473_v27 }
 0xa62   : > { %2184 = shalt.err (!%p2181_p12)
}
 0xa63   : > { %s2185_s3 = scalar_lea.hbm %s2765_s22, 128  ;;  %s2189_s14 = scalar_lea.hbm %s2899_s10, 256 }
 0xa64   : > { %p2186_p8 = scmp.ne.s32.totalorder %s2765_s22, %s2185_s3  ;;  %p2190_p5 = scmp.lt.u32.totalorder %s2765_s22, %s2899_s10 }
 0xa65   : > { %p2191_p9 = scmp.lt.u32.totalorder %s2189_s14, %s2185_s3  ;;  %p2193_p4 = scmp.lt.u32.totalorder %s2185_s3, %s2765_s22 }
 0xa66   : > { %p2187_p11 = pnand %p2186_p8, %p2900_p7 }
 0xa67   : > { %p2192_p2 = por %p2191_p9, %p2190_p5 }
 0xa68   : > { %p2188_p10 = pneg %p2187_p11 }
 0xa69   : > { %p2194_p3 = por %p2193_p4, %p2192_p2 }
 0xa6b   : > { %p2195_p1 = pnand %p2194_p3, %p2188_p10 }
 0xa6d   : > { %2198 = shalt.err (!%p2195_p1)
}
 0xa6e   : > { %1869 = dma.vmem_to_hbm [thread:$0]  (%p2900_p7), %s2767_s11, 128, %s2765_s22, %s1480_s29  }
 0xa6f PF: > { %s2901_s25 = sld [smem:[#allocation22_spill]]  ;;  %s2902_s13 = sld [smem:[#allocation26_spill]] }
 0xa70   : > { %s2903_s23 = sld [smem:[#allocation25_spill]] }
 0xa75   : > { %s1506_s30 = sand.u32 1, %s2901_s25   ;;  %p2904_p13 = scmp.ne.s32.totalorder %s2902_s13, 0 }
 0xa76   : > { %p2905_p6 = scmp.ge.s32.totalorder %s2903_s23, 2  ;;  %s1507_s16 = scalar_lea.sflag [#allocation7], %s1506_s30 }
 0xa78   : > { %p1892_p0 = pnand %p2905_p6, %p2904_p13 }
 0xa7a   : > { %2240 = dma.done.wait (!%p1892_p0), %s1507_s16, 128  }
 0xa7b   : > { %2242 = vsyncadd (!%p1892_p0), %s1507_s16, 4294967168  ;;  %s32_s22 = sadd.s32 1, %s2903_s23   ;;  %s2906_s12 = sld [smem:[#allocation29_spill]] }
 0xa7c   : > { %p29_p12 = scmp.ge.s32.totalorder %s32_s22, 4   ;;  %s2907_s20 = sld [smem:[#allocation24_spill]] }
 0xa7d   : > { %s2908_s21 = sld [smem:[#allocation27_spill]]  ;;  %s2909_s17 = smov %s2249_s18 }
 0xa7e   : > { %s2910_s18 = smov %s2253_s19  ;;  %31 = sbr.rel (!%p29_p12) target bundleno = 18 (0x12), region = 149 }
 0xa81   : > { %s2911_s19 = smov %s2906_s12 }
 0xa85   :  { %1512 = vsyncpa [#allocation6], 1 }
 0xa86   :  { %1514 = vsyncpa [#allocation6 + $0x1], 1 }
 0xa87   :  { %1515 = vsyncpa [#allocation9], 1 }
 0xa88   :  { %1517 = vsyncpa [#allocation9 + $0x1], 1 }
 0xa89   :  { %1518 = vsyncpa [#allocation12], 1 }
 0xa8a   :  { %1519 = vsyncpa [#allocation15], 1 }
 0xa8b   :  { %1520 = vsyncpa [#allocation7], 1 }
 0xa8c   :  { %1522 = vsyncpa [#allocation7 + $0x1], 1 }

</bundles_post_ra>
